<compile_context>
chip_gen: v7x
topology: tpu7x:2x2x1
jax: 0.10.0
libtpu: 0.0.40
codegen_flags: <defaults>
</compile_context>

<pallas_src>
import math

import jax
import jax.numpy as jnp
from jax import lax
from jax.experimental import pallas as pl
from jax.experimental.pallas import tpu as pltpu

# ----------------------------- model dims ---------------------------------
B = 2        # batch
S = 8        # sequence length
D = 32       # per-head / model dim
H = 4        # number of heads
HID = 64     # hidden_mlp_dim
EPS = 1e-9
NEG = -1000000000.0

BS = B * S            # 16 tokens (batch folded into rows)
HB = H * B            # 8 (head, batch) blocks
FOLD = H * BS         # 64 rows once heads are folded into the row axis
QKV = 3 * H * D       # 384 fused qkv width

# ---- slab_a layout: rows 0..31 = fused qkv weight, then one row per bias/LN vector
ROW_QKV_B   = 32
ROW_DENSE_B = 33
ROW_LN1_G   = 34
ROW_LN1_B   = 35
ROW_MLPH_B  = 36
ROW_MLPO_B  = 37
ROW_LN2_G   = 38
ROW_LN2_B   = 39
SLAB_A_ROWS  = 40
SLAB_A_LANES = QKV          # 384

# ---- slab_b layout: dense_w, mlp_hidden_w, mlp_out_w, folded NEG mask
ROW_DENSE_W = 0             # 128 rows
ROW_MLPH_W  = 128           # 32 rows
ROW_MLPO_W  = 160           # 64 rows
ROW_MASK    = 224           # 64 rows
SLAB_B_ROWS  = 288
SLAB_B_LANES = 64


# ------------------------------- kernel ------------------------------------
def transformer_layer_kernel(x_ref, sa_ref, sb_ref, out_ref, attnw_ref):
    x = x_ref[...]                                                   # (16, 32)

    # --- fused QKV projection (1/sqrt(D) folded into the q columns host-side) ---
    qkv = (jnp.dot(x, sa_ref[0:D, :], preferred_element_type=jnp.float32)
           + sa_ref[ROW_QKV_B:ROW_QKV_B + 1, :])                     # (16, 384)

    # --- fold heads into the row axis: (H*BS, D) = (64, 32), head-major rows ---
    q_f = jnp.concatenate(
        [qkv[:, h * D:(h + 1) * D] for h in range(H)], axis=0)
    k_f = jnp.concatenate(
        [qkv[:, H * D + h * D:H * D + (h + 1) * D] for h in range(H)], axis=0)
    v_f = jnp.concatenate(
        [qkv[:, 2 * H * D + h * D:2 * H * D + (h + 1) * D] for h in range(H)], axis=0)

    # --- one score matmul over the folded axis; no explicit transpose formed ---
    s = lax.dot_general(q_f, k_f, (((1,), (1,)), ((), ())),
                        preferred_element_type=jnp.float32)          # (64, 64)
    s = s + sb_ref[ROW_MASK:ROW_MASK + FOLD, :]                      # block-diag NEG mask
    s = s - jnp.max(s, axis=-1, keepdims=True)
    e = jnp.exp(s)                                                   # masked -> exactly 0
    w = e / jnp.sum(e, axis=-1, keepdims=True)                       # (64, 64) softmax
    attnw_ref[...] = w                                               # raw folded weights

    # --- attention values + concat-heads + K=128 output projection ---
    o_f = jnp.dot(w, v_f, preferred_element_type=jnp.float32)        # (64, 32)
    concat = jnp.concatenate(
        [o_f[h * BS:(h + 1) * BS, :] for h in range(H)], axis=1)     # (16, 128)
    attn = (jnp.dot(concat, sb_ref[ROW_DENSE_W:ROW_DENSE_W + H * D, 0:D],
                    preferred_element_type=jnp.float32)
            + sa_ref[ROW_DENSE_B:ROW_DENSE_B + 1, 0:D])              # (16, 32)

    # --- residual + layernorm1 (dropout1 = identity) ---
    y = attn + x
    mu = jnp.mean(y, axis=-1, keepdims=True)
    var = jnp.mean((y - mu) ** 2, axis=-1, keepdims=True)
    y = ((y - mu) / jnp.sqrt(var + EPS) * sa_ref[ROW_LN1_G:ROW_LN1_G + 1, 0:D]
         + sa_ref[ROW_LN1_B:ROW_LN1_B + 1, 0:D])

    # --- MLP + residual + layernorm2 (dropout2 = identity) ---
    hcl = (jnp.dot(y, sb_ref[ROW_MLPH_W:ROW_MLPH_W + D, 0:HID],
                   preferred_element_type=jnp.float32)
           + sa_ref[ROW_MLPH_B:ROW_MLPH_B + 1, 0:HID])
    hcl = jnp.maximum(hcl, 0.0)
    m = (jnp.dot(hcl, sb_ref[ROW_MLPO_W:ROW_MLPO_W + HID, 0:D],
                 preferred_element_type=jnp.float32)
         + sa_ref[ROW_MLPO_B:ROW_MLPO_B + 1, 0:D])
    z = m + y
    mu2 = jnp.mean(z, axis=-1, keepdims=True)
    var2 = jnp.mean((z - mu2) ** 2, axis=-1, keepdims=True)
    z = ((z - mu2) / jnp.sqrt(var2 + EPS) * sa_ref[ROW_LN2_G:ROW_LN2_G + 1, 0:D]
         + sa_ref[ROW_LN2_B:ROW_LN2_B + 1, 0:D])

    out_ref[...] = z                                                 # natural (16, 32)


# ----------------------------- host-side packing ---------------------------
def _pad_lanes(a, n):
    return jnp.pad(a, ((0, 0), (0, n - a.shape[1])))


def pack_params(params, mask):
    (wq_w, wq_b, wk_w, wk_b, wv_w, wv_b, dense_w, dense_b,
     ln1_g, ln1_b, mlp_h_w, mlp_h_b, mlp_o_w, mlp_o_b, ln2_g, ln2_b) = params
    scale = 1.0 / math.sqrt(D)

    # slab A: fused qkv weight (scale folded into q) + all bias / LayerNorm rows
    wqkv = jnp.concatenate([wq_w * scale, wk_w, wv_w], axis=1)       # (32, 384)
    qkv_b = jnp.concatenate([wq_b * scale, wk_b, wv_b], axis=1)      # (1, 384)
    slab_a = jnp.concatenate([
        wqkv, qkv_b,
        _pad_lanes(dense_b, SLAB_A_LANES),
        _pad_lanes(ln1_g, SLAB_A_LANES), _pad_lanes(ln1_b, SLAB_A_LANES),
        _pad_lanes(mlp_h_b, SLAB_A_LANES), _pad_lanes(mlp_o_b, SLAB_A_LANES),
        _pad_lanes(ln2_g, SLAB_A_LANES), _pad_lanes(ln2_b, SLAB_A_LANES),
    ], axis=0)                                                       # (40, 384)

    # slab B: dense + mlp weights + precomputed folded NEG mask (64, 64)
    eye_hb = jnp.eye(HB, dtype=jnp.float32)
    block_ones = jnp.kron(eye_hb, jnp.ones((S, S), jnp.float32))
    neg_mask = NEG * ((1.0 - block_ones)
                      + jnp.kron(eye_hb, mask.astype(jnp.float32)))  # (64, 64)
    slab_b = jnp.concatenate([
        _pad_lanes(dense_w, SLAB_B_LANES),                           # (128, 64)
        _pad_lanes(mlp_h_w, SLAB_B_LANES),                           # (32, 64)
        _pad_lanes(mlp_o_w, SLAB_B_LANES),                           # (64, 64)
        neg_mask,                                                    # (64, 64)
    ], axis=0)                                                       # (288, 64)
    return slab_a, slab_b


@jax.jit
def transformer_layer(x, mask, params):
    slab_a, slab_b = pack_params(params, mask)
    x2d = x.reshape(BS, D)

    def full(shape):
        n = len(shape)
        return pl.BlockSpec(shape, lambda i: (0,) * n)

    out2d, w_fold = pl.pallas_call(
        transformer_layer_kernel,
        out_shape=[jax.ShapeDtypeStruct((BS, D), jnp.float32),       # (16, 32)
                   jax.ShapeDtypeStruct((FOLD, FOLD), jnp.float32)], # (64, 64)
        grid_spec=pltpu.PrefetchScalarGridSpec(
            num_scalar_prefetch=0,
            # Single grid step: everything fits VMEM; avoids per-step overhead and
            # weight re-DMA (v5e/v6e are single-TC; at this size v7x splitting loses).
            grid=(1,),
            in_specs=[full((BS, D)),
                      full((SLAB_A_ROWS, SLAB_A_LANES)),
                      full((SLAB_B_ROWS, SLAB_B_LANES))],
            out_specs=[full((BS, D)), full((FOLD, FOLD))]),
        compiler_params=pltpu.CompilerParams(
            dimension_semantics=("arbitrary",)),
        cost_estimate=pl.CostEstimate(flops=1_200_000, transcendentals=4_200,
                                      bytes_accessed=155_000),
    )(x2d, slab_a, slab_b)

    out = out2d.reshape(B, S, D)
    # Wrapper-side extraction of the per-(batch, head) diagonal (S, S) blocks.
    attn_w = jnp.stack([
        jnp.stack([w_fold[h * BS + b * S:h * BS + (b + 1) * S,
                          h * BS + b * S:h * BS + (b + 1) * S]
                   for h in range(H)], axis=0)
        for b in range(B)], axis=0)                                  # (B, H, S, S)
    return out, attn_w


# --------------------------- pure-JAX reference ----------------------------
def reference(x, mask, params):
    (wq_w, wq_b, wk_w, wk_b, wv_w, wv_b, dense_w, dense_b,
     ln1_g, ln1_b, mlp_h_w, mlp_h_b, mlp_o_w, mlp_o_b, ln2_g, ln2_b) = params

    def split_heads(t):                       # (B,S,D*H) -> (B,H,S,D)
        return t.reshape(B, S, H, D).transpose(0, 2, 1, 3)

    q = split_heads(x @ wq_w + wq_b)
    k = split_heads(x @ wk_w + wk_b)
    v = split_heads(x @ wv_w + wv_b)
    scores = jnp.einsum("bhsd,bhtd->bhst", q, k) / math.sqrt(D)
    scores = scores + mask * NEG
    w = jax.nn.softmax(scores, axis=-1)
    sa = jnp.einsum("bhst,bhtd->bhsd", w, v)
    concat = sa.transpose(0, 2, 1, 3).reshape(B, S, H * D)
    attn = concat @ dense_w + dense_b

    def ln(t, g, b):
        mu = t.mean(-1, keepdims=True)
        var = ((t - mu) ** 2).mean(-1, keepdims=True)
        return (t - mu) / jnp.sqrt(var + EPS) * g + b

    y = ln(attn + x, ln1_g, ln1_b)
    m = jnp.maximum(y @ mlp_h_w + mlp_h_b, 0.0) @ mlp_o_w + mlp_o_b
    out = ln(m + y, ln2_g, ln2_b)
    return out, w


# --------------------------------- main ------------------------------------
if __name__ == "__main__":
    key = jax.random.PRNGKey(0)
    ks = jax.random.split(key, 20)

    def init(k, shape, scale=0.05):
        return (scale * jax.random.normal(k, shape)).astype(jnp.float32)

    params = (
        init(ks[0], (D, D * H)), init(ks[1], (1, D * H)),   # wq
        init(ks[2], (D, D * H)), init(ks[3], (1, D * H)),   # wk
        init(ks[4], (D, D * H)), init(ks[5], (1, D * H)),   # wv
        init(ks[6], (D * H, D)), init(ks[7], (1, D)),       # dense
        jnp.ones((1, D), jnp.float32), jnp.zeros((1, D), jnp.float32),  # ln1
        init(ks[8], (D, HID)), init(ks[9], (1, HID)),        # mlp_hidden
        init(ks[10], (HID, D)), init(ks[11], (1, D)),        # mlp_out
        jnp.ones((1, D), jnp.float32), jnp.zeros((1, D), jnp.float32),  # ln2
    )

    x = jax.random.normal(ks[12], (B, S, D), dtype=jnp.float32)
    # causal (look-ahead) mask: 1 above the diagonal, 0 elsewhere
    mask = jnp.triu(jnp.ones((S, S), dtype=jnp.float32), k=1)

    out, attn_w = transformer_layer(x, mask, params)
    out = jax.block_until_ready(out)
    attn_w = jax.block_until_ready(attn_w)

    ref_out, ref_w = reference(x, mask, params)
    assert jnp.allclose(out, ref_out, atol=1e-4, rtol=1e-4), "output mismatch"
    assert jnp.allclose(attn_w, ref_w, atol=1e-5, rtol=1e-4), "attn-weights mismatch"

    print("KERNEL_OK")
</pallas_src>

<mosaic_0001>
module attributes {stable_mosaic.version = 11 : i64} {
  func.func @transformer_layer_kernel(%arg0: i32, %arg1: memref<16x32xf32, #tpu.memory_space<vmem>>, %arg2: memref<40x384xf32, #tpu.memory_space<vmem>>, %arg3: memref<288x64xf32, #tpu.memory_space<vmem>>, %arg4: memref<16x32xf32, #tpu.memory_space<vmem>>, %arg5: memref<64x64xf32, #tpu.memory_space<vmem>>) attributes {dimension_semantics = [#tpu.dimension_semantics<arbitrary>], iteration_bounds = array<i64: 1>, scalar_prefetch = 0 : i64, scratch_operands = 0 : i64, tpu.core_type = #tpu.core_type<tc>, window_params = [{pipeline_mode = #tpu.pipeline_mode<synchronous>, transform_indices = @transform_0, window_bounds = array<i64: 16, 32>}, {pipeline_mode = #tpu.pipeline_mode<synchronous>, transform_indices = @transform_1, window_bounds = array<i64: 40, 384>}, {pipeline_mode = #tpu.pipeline_mode<synchronous>, transform_indices = @transform_2, window_bounds = array<i64: 288, 64>}, {pipeline_mode = #tpu.pipeline_mode<synchronous>, transform_indices = @transform_3, window_bounds = array<i64: 16, 32>}, {pipeline_mode = #tpu.pipeline_mode<synchronous>, transform_indices = @transform_4, window_bounds = array<i64: 64, 64>}]} {
    %c0 = arith.constant 0 : index
    %c0_0 = arith.constant 0 : index
    %0 = vector.load %arg1[%c0, %c0_0] : memref<16x32xf32, #tpu.memory_space<vmem>>, vector<16x32xf32>
    %c0_1 = arith.constant 0 : index
    %c0_2 = arith.constant 0 : index
    %1 = vector.load %arg2[%c0_1, %c0_2] : memref<40x384xf32, #tpu.memory_space<vmem>>, vector<32x384xf32>
    %cst = arith.constant dense<0.000000e+00> : vector<16x384xf32>
    %2 = tpu.matmul %0, %1, %cst {dimension_numbers = #tpu.dot_dimension_numbers<[1], [0], [0], [1], [0, 0, 1, 1], [], []>} : vector<16x32xf32>, vector<32x384xf32>, vector<16x384xf32> -> vector<16x384xf32>
    %c32 = arith.constant 32 : index
    %c0_3 = arith.constant 0 : index
    %3 = vector.load %arg2[%c32, %c0_3] : memref<40x384xf32, #tpu.memory_space<vmem>>, vector<1x384xf32>
    %4 = vector.broadcast %3 : vector<1x384xf32> to vector<16x384xf32>
    %5 = arith.addf %2, %4 : vector<16x384xf32>
    %6 = vector.extract_strided_slice %5 {offsets = [0, 0], sizes = [16, 32], strides = [1, 1]} : vector<16x384xf32> to vector<16x32xf32>
    %7 = vector.extract_strided_slice %5 {offsets = [0, 32], sizes = [16, 32], strides = [1, 1]} : vector<16x384xf32> to vector<16x32xf32>
    %8 = vector.extract_strided_slice %5 {offsets = [0, 64], sizes = [16, 32], strides = [1, 1]} : vector<16x384xf32> to vector<16x32xf32>
    %9 = vector.extract_strided_slice %5 {offsets = [0, 96], sizes = [16, 32], strides = [1, 1]} : vector<16x384xf32> to vector<16x32xf32>
    %10 = tpu.concatenate %6, %7, %8, %9 in 0 : vector<16x32xf32>, vector<16x32xf32>, vector<16x32xf32>, vector<16x32xf32> -> vector<64x32xf32>
    %11 = vector.extract_strided_slice %5 {offsets = [0, 128], sizes = [16, 32], strides = [1, 1]} : vector<16x384xf32> to vector<16x32xf32>
    %12 = vector.extract_strided_slice %5 {offsets = [0, 160], sizes = [16, 32], strides = [1, 1]} : vector<16x384xf32> to vector<16x32xf32>
    %13 = vector.extract_strided_slice %5 {offsets = [0, 192], sizes = [16, 32], strides = [1, 1]} : vector<16x384xf32> to vector<16x32xf32>
    %14 = vector.extract_strided_slice %5 {offsets = [0, 224], sizes = [16, 32], strides = [1, 1]} : vector<16x384xf32> to vector<16x32xf32>
    %15 = tpu.concatenate %11, %12, %13, %14 in 0 : vector<16x32xf32>, vector<16x32xf32>, vector<16x32xf32>, vector<16x32xf32> -> vector<64x32xf32>
    %16 = vector.extract_strided_slice %5 {offsets = [0, 256], sizes = [16, 32], strides = [1, 1]} : vector<16x384xf32> to vector<16x32xf32>
    %17 = vector.extract_strided_slice %5 {offsets = [0, 288], sizes = [16, 32], strides = [1, 1]} : vector<16x384xf32> to vector<16x32xf32>
    %18 = vector.extract_strided_slice %5 {offsets = [0, 320], sizes = [16, 32], strides = [1, 1]} : vector<16x384xf32> to vector<16x32xf32>
    %19 = vector.extract_strided_slice %5 {offsets = [0, 352], sizes = [16, 32], strides = [1, 1]} : vector<16x384xf32> to vector<16x32xf32>
    %20 = tpu.concatenate %16, %17, %18, %19 in 0 : vector<16x32xf32>, vector<16x32xf32>, vector<16x32xf32>, vector<16x32xf32> -> vector<64x32xf32>
    %cst_4 = arith.constant dense<0.000000e+00> : vector<64x64xf32>
    %21 = tpu.matmul %10, %15, %cst_4 {dimension_numbers = #tpu.dot_dimension_numbers<[1], [1], [0], [0], [0, 0, 1, 0], [], []>} : vector<64x32xf32>, vector<64x32xf32>, vector<64x64xf32> -> vector<64x64xf32>
    %c224 = arith.constant 224 : index
    %c0_5 = arith.constant 0 : index
    %22 = vector.load %arg3[%c224, %c0_5] : memref<288x64xf32, #tpu.memory_space<vmem>>, vector<64x64xf32>
    %23 = arith.addf %21, %22 : vector<64x64xf32>
    %cst_6 = arith.constant dense<0xFF800000> : vector<64xf32>
    %24 = vector.multi_reduction <maximumf>, %23, %cst_6 [1] : vector<64x64xf32> to vector<64xf32>
    %25 = vector.shape_cast %24 : vector<64xf32> to vector<64x1xf32>
    %26 = vector.broadcast %25 : vector<64x1xf32> to vector<64x64xf32>
    %27 = arith.subf %23, %26 : vector<64x64xf32>
    %28 = math.exp %27 : vector<64x64xf32>
    %cst_7 = arith.constant dense<0.000000e+00> : vector<64xf32>
    %29 = vector.multi_reduction <add>, %28, %cst_7 [1] : vector<64x64xf32> to vector<64xf32>
    %30 = vector.shape_cast %29 : vector<64xf32> to vector<64x1xf32>
    %31 = vector.broadcast %30 : vector<64x1xf32> to vector<64x64xf32>
    %32 = arith.divf %28, %31 : vector<64x64xf32>
    %c0_8 = arith.constant 0 : index
    %c0_9 = arith.constant 0 : index
    %33 = vector.load %arg5[%c0_8, %c0_9] : memref<64x64xf32, #tpu.memory_space<vmem>>, vector<64x64xf32>
    tpu.vector_store %arg5[%c0_8, %c0_9], %32 {strides = array<i32>} : memref<64x64xf32, #tpu.memory_space<vmem>>, vector<64x64xf32>,
    %cst_10 = arith.constant dense<0.000000e+00> : vector<64x32xf32>
    %34 = tpu.matmul %32, %20, %cst_10 {dimension_numbers = #tpu.dot_dimension_numbers<[1], [0], [0], [1], [0, 0, 1, 1], [], []>} : vector<64x64xf32>, vector<64x32xf32>, vector<64x32xf32> -> vector<64x32xf32>
    %35 = vector.extract_strided_slice %34 {offsets = [0, 0], sizes = [16, 32], strides = [1, 1]} : vector<64x32xf32> to vector<16x32xf32>
    %36 = vector.extract_strided_slice %34 {offsets = [16, 0], sizes = [16, 32], strides = [1, 1]} : vector<64x32xf32> to vector<16x32xf32>
    %37 = vector.extract_strided_slice %34 {offsets = [32, 0], sizes = [16, 32], strides = [1, 1]} : vector<64x32xf32> to vector<16x32xf32>
    %38 = vector.extract_strided_slice %34 {offsets = [48, 0], sizes = [16, 32], strides = [1, 1]} : vector<64x32xf32> to vector<16x32xf32>
    %39 = tpu.concatenate %35, %36, %37, %38 in 1 : vector<16x32xf32>, vector<16x32xf32>, vector<16x32xf32>, vector<16x32xf32> -> vector<16x128xf32>
    %c0_11 = arith.constant 0 : index
    %c0_12 = arith.constant 0 : index
    %40 = vector.load %arg3[%c0_11, %c0_12] : memref<288x64xf32, #tpu.memory_space<vmem>>, vector<128x32xf32>
    %cst_13 = arith.constant dense<0.000000e+00> : vector<16x32xf32>
    %41 = tpu.matmul %39, %40, %cst_13 {dimension_numbers = #tpu.dot_dimension_numbers<[1], [0], [0], [1], [0, 0, 1, 1], [], []>} : vector<16x128xf32>, vector<128x32xf32>, vector<16x32xf32> -> vector<16x32xf32>
    %c33 = arith.constant 33 : index
    %c0_14 = arith.constant 0 : index
    %42 = vector.load %arg2[%c33, %c0_14] : memref<40x384xf32, #tpu.memory_space<vmem>>, vector<1x32xf32>
    %43 = vector.broadcast %42 : vector<1x32xf32> to vector<16x32xf32>
    %44 = arith.addf %41, %43 : vector<16x32xf32>
    %45 = arith.addf %44, %0 : vector<16x32xf32>
    %cst_15 = arith.constant dense<0.000000e+00> : vector<16xf32>
    %46 = vector.multi_reduction <add>, %45, %cst_15 [1] : vector<16x32xf32> to vector<16xf32>
    %47 = vector.shape_cast %46 : vector<16xf32> to vector<16x1xf32>
    %cst_16 = arith.constant 3.200000e+01 : f32
    %48 = vector.broadcast %cst_16 : f32 to vector<16x1xf32>
    %49 = arith.divf %47, %48 : vector<16x1xf32>
    %50 = vector.broadcast %49 : vector<16x1xf32> to vector<16x32xf32>
    %51 = arith.subf %45, %50 : vector<16x32xf32>
    %52 = arith.mulf %51, %51 : vector<16x32xf32>
    %cst_17 = arith.constant dense<0.000000e+00> : vector<16xf32>
    %53 = vector.multi_reduction <add>, %52, %cst_17 [1] : vector<16x32xf32> to vector<16xf32>
    %54 = vector.shape_cast %53 : vector<16xf32> to vector<16x1xf32>
    %cst_18 = arith.constant 3.200000e+01 : f32
    %55 = vector.broadcast %cst_18 : f32 to vector<16x1xf32>
    %56 = arith.divf %54, %55 : vector<16x1xf32>
    %57 = vector.broadcast %49 : vector<16x1xf32> to vector<16x32xf32>
    %58 = arith.subf %45, %57 : vector<16x32xf32>
    %cst_19 = arith.constant 9.99999971E-10 : f32
    %59 = vector.broadcast %cst_19 : f32 to vector<16x1xf32>
    %60 = arith.addf %56, %59 : vector<16x1xf32>
    %61 = math.sqrt %60 : vector<16x1xf32>
    %62 = vector.broadcast %61 : vector<16x1xf32> to vector<16x32xf32>
    %63 = arith.divf %58, %62 : vector<16x32xf32>
    %c34 = arith.constant 34 : index
    %c0_20 = arith.constant 0 : index
    %64 = vector.load %arg2[%c34, %c0_20] : memref<40x384xf32, #tpu.memory_space<vmem>>, vector<1x32xf32>
    %65 = vector.broadcast %64 : vector<1x32xf32> to vector<16x32xf32>
    %66 = arith.mulf %63, %65 : vector<16x32xf32>
    %c35 = arith.constant 35 : index
    %c0_21 = arith.constant 0 : index
    %67 = vector.load %arg2[%c35, %c0_21] : memref<40x384xf32, #tpu.memory_space<vmem>>, vector<1x32xf32>
    %68 = vector.broadcast %67 : vector<1x32xf32> to vector<16x32xf32>
    %69 = arith.addf %66, %68 : vector<16x32xf32>
    %c128 = arith.constant 128 : index
    %c0_22 = arith.constant 0 : index
    %70 = vector.load %arg3[%c128, %c0_22] : memref<288x64xf32, #tpu.memory_space<vmem>>, vector<32x64xf32>
    %cst_23 = arith.constant dense<0.000000e+00> : vector<16x64xf32>
    %71 = tpu.matmul %69, %70, %cst_23 {dimension_numbers = #tpu.dot_dimension_numbers<[1], [0], [0], [1], [0, 0, 1, 1], [], []>} : vector<16x32xf32>, vector<32x64xf32>, vector<16x64xf32> -> vector<16x64xf32>
    %c36 = arith.constant 36 : index
    %c0_24 = arith.constant 0 : index
    %72 = vector.load %arg2[%c36, %c0_24] : memref<40x384xf32, #tpu.memory_space<vmem>>, vector<1x64xf32>
    %73 = vector.broadcast %72 : vector<1x64xf32> to vector<16x64xf32>
    %74 = arith.addf %71, %73 : vector<16x64xf32>
    %cst_25 = arith.constant 0.000000e+00 : f32
    %75 = vector.broadcast %cst_25 : f32 to vector<16x64xf32>
    %76 = arith.maximumf %74, %75 : vector<16x64xf32>
    %c160 = arith.constant 160 : index
    %c0_26 = arith.constant 0 : index
    %77 = vector.load %arg3[%c160, %c0_26] : memref<288x64xf32, #tpu.memory_space<vmem>>, vector<64x32xf32>
    %cst_27 = arith.constant dense<0.000000e+00> : vector<16x32xf32>
    %78 = tpu.matmul %76, %77, %cst_27 {dimension_numbers = #tpu.dot_dimension_numbers<[1], [0], [0], [1], [0, 0, 1, 1], [], []>} : vector<16x64xf32>, vector<64x32xf32>, vector<16x32xf32> -> vector<16x32xf32>
    %c37 = arith.constant 37 : index
    %c0_28 = arith.constant 0 : index
    %79 = vector.load %arg2[%c37, %c0_28] : memref<40x384xf32, #tpu.memory_space<vmem>>, vector<1x32xf32>
    %80 = vector.broadcast %79 : vector<1x32xf32> to vector<16x32xf32>
    %81 = arith.addf %78, %80 : vector<16x32xf32>
    %82 = arith.addf %81, %69 : vector<16x32xf32>
    %cst_29 = arith.constant dense<0.000000e+00> : vector<16xf32>
    %83 = vector.multi_reduction <add>, %82, %cst_29 [1] : vector<16x32xf32> to vector<16xf32>
    %84 = vector.shape_cast %83 : vector<16xf32> to vector<16x1xf32>
    %cst_30 = arith.constant 3.200000e+01 : f32
    %85 = vector.broadcast %cst_30 : f32 to vector<16x1xf32>
    %86 = arith.divf %84, %85 : vector<16x1xf32>
    %87 = vector.broadcast %86 : vector<16x1xf32> to vector<16x32xf32>
    %88 = arith.subf %82, %87 : vector<16x32xf32>
    %89 = arith.mulf %88, %88 : vector<16x32xf32>
    %cst_31 = arith.constant dense<0.000000e+00> : vector<16xf32>
    %90 = vector.multi_reduction <add>, %89, %cst_31 [1] : vector<16x32xf32> to vector<16xf32>
    %91 = vector.shape_cast %90 : vector<16xf32> to vector<16x1xf32>
    %cst_32 = arith.constant 3.200000e+01 : f32
    %92 = vector.broadcast %cst_32 : f32 to vector<16x1xf32>
    %93 = arith.divf %91, %92 : vector<16x1xf32>
    %94 = vector.broadcast %86 : vector<16x1xf32> to vector<16x32xf32>
    %95 = arith.subf %82, %94 : vector<16x32xf32>
    %cst_33 = arith.constant 9.99999971E-10 : f32
    %96 = vector.broadcast %cst_33 : f32 to vector<16x1xf32>
    %97 = arith.addf %93, %96 : vector<16x1xf32>
    %98 = math.sqrt %97 : vector<16x1xf32>
    %99 = vector.broadcast %98 : vector<16x1xf32> to vector<16x32xf32>
    %100 = arith.divf %95, %99 : vector<16x32xf32>
    %c38 = arith.constant 38 : index
    %c0_34 = arith.constant 0 : index
    %101 = vector.load %arg2[%c38, %c0_34] : memref<40x384xf32, #tpu.memory_space<vmem>>, vector<1x32xf32>
    %102 = vector.broadcast %101 : vector<1x32xf32> to vector<16x32xf32>
    %103 = arith.mulf %100, %102 : vector<16x32xf32>
    %c39 = arith.constant 39 : index
    %c0_35 = arith.constant 0 : index
    %104 = vector.load %arg2[%c39, %c0_35] : memref<40x384xf32, #tpu.memory_space<vmem>>, vector<1x32xf32>
    %105 = vector.broadcast %104 : vector<1x32xf32> to vector<16x32xf32>
    %106 = arith.addf %103, %105 : vector<16x32xf32>
    %c0_36 = arith.constant 0 : index
    %c0_37 = arith.constant 0 : index
    %107 = vector.load %arg4[%c0_36, %c0_37] : memref<16x32xf32, #tpu.memory_space<vmem>>, vector<16x32xf32>
    tpu.vector_store %arg4[%c0_36, %c0_37], %106 {strides = array<i32>} : memref<16x32xf32, #tpu.memory_space<vmem>>, vector<16x32xf32>,
    return
  }
  func.func @transform_0(%arg0: i32) -> (i32, i32) {
    %c0_i32 = arith.constant 0 : i32
    %c0_i32_0 = arith.constant 0 : i32
    %c0_i32_1 = arith.constant 0 : i32
    return %c0_i32, %c0_i32_0 : i32, i32
  }
  func.func @transform_1(%arg0: i32) -> (i32, i32) {
    %c0_i32 = arith.constant 0 : i32
    %c0_i32_0 = arith.constant 0 : i32
    %c0_i32_1 = arith.constant 0 : i32
    return %c0_i32, %c0_i32_0 : i32, i32
  }
  func.func @transform_2(%arg0: i32) -> (i32, i32) {
    %c0_i32 = arith.constant 0 : i32
    %c0_i32_0 = arith.constant 0 : i32
    %c0_i32_1 = arith.constant 0 : i32
    return %c0_i32, %c0_i32_0 : i32, i32
  }
  func.func @transform_3(%arg0: i32) -> (i32, i32) {
    %c0_i32 = arith.constant 0 : i32
    %c0_i32_0 = arith.constant 0 : i32
    %c0_i32_1 = arith.constant 0 : i32
    return %c0_i32, %c0_i32_0 : i32, i32
  }
  func.func @transform_4(%arg0: i32) -> (i32, i32) {
    %c0_i32 = arith.constant 0 : i32
    %c0_i32_0 = arith.constant 0 : i32
    %c0_i32_1 = arith.constant 0 : i32
    return %c0_i32, %c0_i32_0 : i32, i32
  }
}

</mosaic_0001>

<bundles_post_ra>
// kernel: transformer_layer.1
= control target key start
LH: loop header
LB: loop body
LE: loop exit
PB: predicated region body
PF: predicated region fallthrough
CT: control target
= control target key end

     0   :  { %v1520_v7 = vmov 0.0   ;;  %s1881_s0 = inlined_call_operand.vmem [shape: f32[16,32], index: 0, kind: input, shape index: {}]   ;;  %s1882_s1 = inlined_call_operand.vmem [shape: f32[40,384], index: 1, kind: input, shape index: {}]   ;;  %s1883_s2 = inlined_call_operand.vmem [shape: f32[288,64], index: 2, kind: input, shape index: {}]   ;;  %s1884_s3 = inlined_call_operand.hbm [shape: f32[16,32], index: 3, kind: output, shape index: {0}]   ;;  %s1885_s4 = inlined_call_operand.vmem [shape: f32[64,64], index: 4, kind: output, shape index: {1}]  }
   0x1   :  { %v20_v0 = vld [vmem:[%s1882_s1 + $0x8] sm:$0xff]  ;;  %v23_v1 = vld [vmem:[%s1882_s1 + $0x20] sm:$0xff]  ;;  %v22_v4 = vld [vmem:[%s1882_s1 + $0x18] sm:$0xff]  ;;  %120 = vmatprep.mubr.f32.mxu1 %v1520_v7 }
   0x2   :  { %v19_v2 = vld [vmem:[%s1882_s1] sm:$0xff]  ;;  %v1284_v3 = vpack.c.bf16 %v23_v1, %v20_v0  ;;  %v26_v5 = vld [vmem:[%s1882_s1 + $0x38] sm:$0xff]  ;;  %v29_v6 = vld [vmem:[%s1882_s1 + $0x50] sm:$0xff] }
   0x3   :  { %v1286_v8 = vpack.c.bf16 %v22_v4, %v19_v2  ;;  %v1288_v9 = vpack.c.bf16 %v29_v6, %v26_v5  ;;  %v25_v10 = vld [vmem:[%s1882_s1 + $0x30] sm:$0xff]  ;;  %v28_v11 = vld [vmem:[%s1882_s1 + $0x48] sm:$0xff] }
   0x4   :  { %1285 = vmatprep.subr.bf16.mxu1 %v1284_v3 }
   0x5   :  { %10 = vsyncpa [#allocation3], 0  ;;  %1287 = vmatpush1.bf16.msra.mxu1 %v1286_v8  ;;  %v1290_v12 = vpack.c.bf16 %v28_v11, %v25_v10  ;;  %v1579_v13 = vld [vmem:[%s1881_s0] sm:$0xff]  ;;  %vm49_vm0 = vcmask 261120   ;;  %v1586_v14 = vld [vmem:[%s1881_s0 + $0x8] sm:$0xff]  ;;  %v34_v15 = vlaneseq  ;;  %s1521_s0 = smov 32  }
   0x6   :  { %1289 = vmatprep.subr.bf16.mxu1 %v1288_v9  ;;  %v1598_v18 = vld [vmem:[%s1882_s1 + $0x60] ss:$8 sm:$0x7]  ;;  %vm1606_vm1 = vmpackc.low %vm49_vm0, %vm49_vm0  ;;  %s1522_s11 = smov 96   ;;  %s1523_s12 = smov 64   ;;  %v30_v37 = vld [vmem:[%s1882_s1 + $0x58] sm:$0xff] }
   0x7   :  { %v1592_v16 = vshrl.u32 %v34_v15, 7  ;;  %v21_v33 = vld [vmem:[%s1882_s1 + $0x10] sm:$0xff]  ;;  %v24_v34 = vld [vmem:[%s1882_s1 + $0x28] sm:$0xff]  ;;  %v27_v35 = vld [vmem:[%s1882_s1 + $0x40] sm:$0xff]  ;;  %vm401_vm2 = vcmask 523264   ;;  %vm655_vm3 = vcmask 785408  }
   0x8   :  { %v1292_v36 = vpack.c.bf16 %v24_v34, %v21_v33  ;;  %v1296_v38 = vpack.c.bf16 %v30_v37, %v27_v35  ;;  %v257_v57 = vld [vmem:[%s1883_s2 + $0xe8] sm:$0xff]  ;;  %v256_v58 = vld [vmem:[%s1883_s2 + $0xe0] sm:$0xff]  ;;  %v259_v63 = vld [vmem:[%s1883_s2 + $0xf8] sm:$0xff]  ;;  %s1524_s17 = smov [#allocation2]  }
   0x9   :  { %1291 = vmatpush1.bf16.msra.mxu1 %v1290_v12  ;;  %v36_v17 = vsub.s32 0, %v1592_v16  ;;  %v40_v20 = vsub.s32 1, %v1592_v16  ;;  %v258_v1 = vld [vmem:[%s1883_s2 + $0xf0] sm:$0xff]  ;;  %v260_v8 = vld [vmem:[%s1883_s2 + $0x100] sm:$0xff]  ;;  %s1032_s18 = sshll.u32 %s1524_s17, 4  ;;  %s1033_s18 = int_to_ptr.vmem [resolvable:$true] %s1032_s18 }
   0xa   :  { %1293 = vmatprep.subr.bf16.mxu1 %v1292_v36  ;;  %s1496_s19 = scalar_lea.vmem %s1033_s18, 256  ;;  %p1501_p1 = scmp.lt.s32.totalorder %s1033_s18, %s1033_s18 }
   0xb   :  { %v37_v19 = vrot.slane %v1598_v18, %v36_v17  ;;  %v41_v24 = vrot.slane %v1598_v18, %v40_v20  ;;  %v262_v20 = vld [vmem:[%s1883_s2 + $0x110] sm:$0xff]  ;;  %p1497_p0 = scmp.ne.s32.totalorder %s1033_s18, %s1496_s19  ;;  %p1502_p2 = scmp.lt.s32.totalorder %s1496_s19, %s1496_s19 }
   0xc   :  { %1048 = vmatmul.mubr.msk.f32.vlgmr.msra.gmra.mrb[0].mxu1 %vm49_vm0, %v1579_v13 }
   0xd   :  { %126 = vmatprep.mubr.f32.mxu1 %v1520_v7  ;;  %1295 = vmatpush3.bf16.msra.mxu1 %v1292_v36  ;;  %v261_v7 = vld [vmem:[%s1883_s2 + $0x108] sm:$0xff]  ;;  %p1503_p3 = por %p1502_p2, %p1501_p1 }
   0xe   :  { %1297 = vmatprep.subr.bf16.mxu1 %v1296_v38 }
   0xf   :  { %p1504_p4 = pnand %p1503_p3, %p1497_p0 }
  0x10   :  { %1049 = vmatmul.mubr.msk.f32.gmra.mrb[2].mxu1 %vm49_vm0, %v1586_v14 }
  0x11   :  { %1160 = vmatprep.mubr.msk.f32.mxu1 %vm49_vm0, %v1579_v13  ;;  %1299 = vmatpush3.bf16.msra.mxu1 %v1296_v38 }
  0x14   :  { %1161 = vmatmul.mubr.msk.f32.vlgmr.msra.gmra.mrb[4].mxu1 %vm49_vm0, %v1586_v14 }
  0xdf   :  { %v122_v21 = vpop.f32.mrb[0].mxu1 }
  0xe0   :  { %v123_v22 = vadd.f32 %v122_v21, %v37_v19  ;;  %v124_v23 = vpop.f32.mrb[1].mxu1 }
  0xe1   :  { %v125_v27 = vadd.f32 %v124_v23, %v41_v24 }
  0xe2   :  { %1179 = vmatprep.mubr.msk.f32.mxu0 %vm49_vm0, %v123_v22 }
  0xe3   :  { %v128_v25 = vpop.f32.mrb[2].mxu1 }
  0xe4   :  { %v130_v26 = vpop.f32.mrb[3].mxu1  ;;  %v129_v32 = vadd.f32 %v128_v25, %v37_v19  ;;  %v263_v19 = vld [vmem:[%s1883_s2 + $0x118] sm:$0xff] }
  0xe5   :  { %v131_v28 = vadd.f32 %v130_v26, %v41_v24 }
  0xe7   :  { %v1413_v29 = vpack.i.bf16 %v131_v28, %v125_v27  ;;  %v1300_v30 = vpack.c.bf16 %v131_v28, %v125_v27 }
  0xe9   :  { %1414 = vrot.lane.b32.xlu1 %v1413_v29, %s1521_s0  ;;  %1404 = vrot.lane.b32.xlu0 %v1413_v29, %s1522_s11 }
  0xea   :  { %1302 = vmatprep.subr.msk.bf16.mxu0 %vm1606_vm1, %v1300_v30 }
  0xeb   :  { %1305 = vmatpush3.bf16.xpose.msk.msra.mxu0 %vm1606_vm1, %v1300_v30  ;;  %v1162_v30 = vpop.f32.mrb[4].mxu1 }
  0xec   :  { %v199_v31 = vpop.f32.mrb[5].mxu1 }
  0xed   :  { %1409 = vrot.lane.b32.xlu0 %v1413_v29, %s1523_s12  ;;  %210 = vrot.lane.b32.xlu1 %v123_v22, %s1522_s11  ;;  %v44_v29 = vsub.s32 2, %v1592_v16 }
  0xf1   :  { %212 = vrot.lane.b32.xlu0 %v129_v32, %s1522_s11  ;;  %214 = vrot.lane.b32.xlu1 %v123_v22, %s1523_s12 }
  0xf5   :  { %216 = vrot.lane.b32.xlu0 %v129_v32, %s1523_s12  ;;  %218 = vrot.lane.b32.xlu1 %v123_v22, %s1521_s0 }
  0xf9   :  { %220 = vrot.lane.b32.xlu0 %v129_v32, %s1521_s0 }
 0x15b   :  { %v1405_v39 = vpop.permute.xlu0 %1404  ;;  %v1415_v46 = vpop.permute.xlu1 %1414 }
 0x15c   :  { %v1407_v40 = vunpack.i.h.bf16 %v1405_v39  ;;  %v1406_v41 = vunpack.i.l.bf16 %v1405_v39  ;;  %v1417_v48 = vunpack.i.h.bf16 %v1415_v46  ;;  %v1416_v49 = vunpack.i.l.bf16 %v1415_v46 }
 0x15e   :  { %v1306_v42 = vpack.c.bf16 %v1407_v40, %v1406_v41  ;;  %v1318_v50 = vpack.c.bf16 %v1417_v48, %v1416_v49 }
 0x15f   :  { %v1410_v43 = vpop.permute.xlu0 %1409  ;;  %v211_v51 = vpop.permute.xlu1 %210 }
 0x160   :  { %v1412_v44 = vunpack.i.h.bf16 %v1410_v43  ;;  %v1411_v45 = vunpack.i.l.bf16 %v1410_v43  ;;  %1308 = vmatprep.subr.msk.bf16.mxu0 %vm1606_vm1, %v1306_v42 }
 0x161   :  { %1311 = vmatpush3.bf16.xpose.msk.msra.mxu0 %vm1606_vm1, %v1306_v42 }
 0x162   :  { %v1312_v47 = vpack.c.bf16 %v1412_v44, %v1411_v45 }
 0x163   :  { %v213_v52 = vpop.permute.xlu0 %212  ;;  %v215_v53 = vpop.permute.xlu1 %214 }
 0x164   :  { %1314 = vmatprep.subr.msk.bf16.mxu0 %vm1606_vm1, %v1312_v47 }
 0x167   :  { %v217_v54 = vpop.permute.xlu0 %216  ;;  %v219_v55 = vpop.permute.xlu1 %218 }
 0x169   :  { %1317 = vmatpush3.bf16.xpose.msk.msra.mxu0 %vm1606_vm1, %v1312_v47 }
 0x16a   :  { %1320 = vmatprep.subr.msk.bf16.mxu0 %vm1606_vm1, %v1318_v50 }
 0x16b   :  { %v221_v56 = vpop.permute.xlu0 %220 }
 0x171   :  { %1323 = vmatpush3.bf16.xpose.msk.msra.mxu0 %vm1606_vm1, %v1318_v50 }
 0x178   :  { %1180 = vmatmul.mubr.msk.f32.vlgmr.msra.gmra.mrb[0].mxu0 %vm49_vm0, %v129_v32  ;;  %v45_v32 = vrot.slane %v1598_v18, %v44_v29 }
 0x179   :  { %1182 = vmatprep.mubr.msk.f32.mxu0 %vm49_vm0, %v211_v51 }
 0x17a   :  { %v205_v33 = vadd.f32 %v1162_v30, %v45_v32  ;;  %v200_v34 = vadd.f32 %v199_v31, %v45_v32 }
 0x17c   :  { %1183 = vmatmul.mubr.msk.f32.gmra.mrb[2].mxu0 %vm49_vm0, %v213_v52  ;;  %v1423_v35 = vpack.i.bf16 %v205_v33, %v200_v34  ;;  %v1324_v36 = vpack.c.bf16 %v205_v33, %v200_v34 }
 0x17d   :  { %1185 = vmatprep.mubr.msk.f32.mxu0 %vm49_vm0, %v215_v53 }
 0x17e   :  { %1325 = vmatprep.subr.bf16.mxu1 %v1324_v36 }
 0x17f   :  { %1327 = vmatpush3.bf16.msra.mxu1 %v1324_v36 }
 0x180   :  { %1186 = vmatmul.mubr.msk.f32.gmra.mrb[4].mxu0 %vm49_vm0, %v217_v54 }
 0x181   :  { %1188 = vmatprep.mubr.msk.f32.mxu0 %vm49_vm0, %v219_v55 }
 0x184   :  { %1189 = vmatmul.mubr.msk.f32.gmra.mrb[6].mxu0 %vm49_vm0, %v221_v56 }
 0x24b   :  { %v1181_v59 = vpop.f32.mrb[0].mxu0 }
 0x24c   :  { %v368_v60 = vadd.f32 %v1181_v59, %v257_v57  ;;  %v362_v61 = vpop.f32.mrb[1].mxu0 }
 0x24d   :  { %v363_v62 = vadd.f32 %v362_v61, %v256_v58 }
 0x24e   :  { %v405_v0 = vsel %vm401_vm2, %v368_v60, -inf }
 0x24f   :  { %406 = vmax.xlane.f32.xlu0 %v405_v0  ;;  %v1184_v2 = vpop.f32.mrb[2].mxu0  ;;  %v402_v3 = vsel %vm401_vm2, %v363_v62, -inf }
 0x250   :  { %v378_v4 = vadd.f32 %v1184_v2, %v259_v63  ;;  %v372_v5 = vpop.f32.mrb[3].mxu0  ;;  %403 = vmax.xlane.f32.xlu1 %v402_v3 }
 0x251   :  { %v373_v6 = vadd.f32 %v372_v5, %v258_v1 }
 0x252   :  { %v411_v9 = vsel %vm401_vm2, %v378_v4, -inf }
 0x253   :  { %v1187_v10 = vpop.f32.mrb[4].mxu0  ;;  %v408_v11 = vsel %vm401_vm2, %v373_v6, -inf }
 0x254   :  { %v388_v12 = vadd.f32 %v1187_v10, %v261_v7  ;;  %v382_v15 = vpop.f32.mrb[5].mxu0  ;;  %409 = vmax.xlane.f32.xlu0 %v408_v11  ;;  %412 = vmax.xlane.f32.xlu1 %v411_v9 }
 0x255   :  { %v383_v17 = vadd.f32 %v382_v15, %v260_v8 }
 0x256   :  { %v417_v21 = vsel %vm401_vm2, %v388_v12, -inf }
 0x257   :  { %v1190_v22 = vpop.f32.mrb[6].mxu0  ;;  %v414_v23 = vsel %vm401_vm2, %v383_v17, -inf }
 0x258   :  { %v398_v24 = vadd.f32 %v1190_v22, %v263_v19  ;;  %v392_v25 = vpop.f32.mrb[7].mxu0  ;;  %415 = vmax.xlane.f32.xlu0 %v414_v23  ;;  %418 = vmax.xlane.f32.xlu1 %v417_v21 }
 0x259   :  { %v393_v26 = vadd.f32 %v392_v25, %v262_v20 }
 0x25a   :  { %v423_v27 = vsel %vm401_vm2, %v398_v24, -inf }
 0x25b   :  { %v420_v28 = vsel %vm401_vm2, %v393_v26, -inf }
 0x25c   :  { %421 = vmax.xlane.f32.xlu0 %v420_v28  ;;  %424 = vmax.xlane.f32.xlu1 %v423_v27 }
 0x2dc   :  { %v407_v37 = vpop.xlane.xlu0 %406 }
 0x2dd   :  { %v427_v38 = vsub.f32 %v368_v60, %v407_v37  ;;  %v404_v39 = vpop.xlane.xlu1 %403 }
 0x2de   :  { %v426_v40 = vsub.f32 %v363_v62, %v404_v39 }
 0x2df   :  { %v436_v41 = vmul.f32 1.442695, %v427_v38 }
 0x2e0   :  { %v434_v42 = vmul.f32 1.442695, %v426_v40 }
 0x2e1   :  { %1448 = vpow2.f32 %v436_v41  ;;  %v410_v43 = vpop.xlane.xlu0 %409  ;;  %v413_v44 = vpop.xlane.xlu1 %412 }
 0x2e2   :  { %1450 = vpow2.f32 %v434_v42  ;;  %v428_v16 = vsub.f32 %v373_v6, %v410_v43  ;;  %v429_v45 = vsub.f32 %v378_v4, %v413_v44 }
 0x2e4   :  { %v438_v46 = vmul.f32 1.442695, %v428_v16  ;;  %v440_v18 = vmul.f32 1.442695, %v429_v45 }
 0x2e5   :  { %v416_v47 = vpop.xlane.xlu0 %415  ;;  %v419_v48 = vpop.xlane.xlu1 %418 }
 0x2e6   :  { %1452 = vpow2.f32 %v438_v46  ;;  %v430_v49 = vsub.f32 %v383_v17, %v416_v47  ;;  %v431_v50 = vsub.f32 %v388_v12, %v419_v48 }
 0x2e7   :  { %1454 = vpow2.f32 %v440_v18 }
 0x2e8   :  { %v442_v51 = vmul.f32 1.442695, %v430_v49  ;;  %v444_v52 = vmul.f32 1.442695, %v431_v50  ;;  %v658_v49 = vld [vmem:[%s1883_s2] sm:$0xff]  ;;  %v659_v50 = vld [vmem:[%s1883_s2 + $0x8] sm:$0xff] }
 0x2e9   :  { %v422_v53 = vpop.xlane.xlu0 %421  ;;  %v425_v54 = vpop.xlane.xlu1 %424 }
 0x2ea   :  { %1456 = vpow2.f32 %v442_v51  ;;  %v432_v55 = vsub.f32 %v393_v26, %v422_v53  ;;  %v433_v56 = vsub.f32 %v398_v24, %v425_v54  ;;  %v660_v51 = vld [vmem:[%s1883_s2 + $0x10] sm:$0xff]  ;;  %v661_v53 = vld [vmem:[%s1883_s2 + $0x18] sm:$0xff] }
 0x2eb   :  { %v1449_v57 = vpop.eup %1448  ;;  %1458 = vpow2.f32 %v444_v52  ;;  %v1340_v52 = vpack.c.bf16 %v659_v50, %v658_v49  ;;  %v1344_v54 = vpack.c.bf16 %v661_v53, %v660_v51 }
 0x2ec   :  { %v1451_v58 = vpop.eup %1450  ;;  %v446_v59 = vmul.f32 1.442695, %v432_v55  ;;  %v448_v60 = vmul.f32 1.442695, %v433_v56  ;;  %v453_v61 = vsel %vm401_vm2, %v1449_v57, 0.0  ;;  %v662_v55 = vld [vmem:[%s1883_s2 + $0x20] sm:$0xff] }
 0x2ed   :  { %454 = vadd.xlane.f32.xlu1 %v453_v61  ;;  %v450_v62 = vsel %vm401_vm2, %v1451_v58, 0.0  ;;  %v663_v56 = vld [vmem:[%s1883_s2 + $0x28] sm:$0xff]  ;;  %v666_v61 = vld [vmem:[%s1883_s2 + $0x40] sm:$0xff] }
 0x2ee   :  { %1460 = vpow2.f32 %v446_v59  ;;  %451 = vadd.xlane.f32.xlu0 %v450_v62  ;;  %v665_v59 = vld [vmem:[%s1883_s2 + $0x38] sm:$0xff]  ;;  %v667_v62 = vld [vmem:[%s1883_s2 + $0x48] sm:$0xff] }
 0x2ef   :  { %1462 = vpow2.f32 %v448_v60 }
 0x2f0   :  { %v1453_v63 = vpop.eup %1452 }
 0x2f1   :  { %v1455_v0 = vpop.eup %1454  ;;  %v456_v1 = vsel %vm401_vm2, %v1453_v63, 0.0 }
 0x2f2   :  { %457 = vadd.xlane.f32.xlu0 %v456_v1  ;;  %v459_v2 = vsel %vm401_vm2, %v1455_v0, 0.0  ;;  %v669_v1 = vld [vmem:[%s1883_s2 + $0x58] sm:$0xff] }
 0x2f3   :  { %460 = vadd.xlane.f32.xlu1 %v459_v2 }
 0x2f4   :  { %v1457_v3 = vpop.eup %1456 }
 0x2f5   :  { %v1459_v4 = vpop.eup %1458  ;;  %v462_v5 = vsel %vm401_vm2, %v1457_v3, 0.0 }
 0x2f6   :  { %463 = vadd.xlane.f32.xlu0 %v462_v5  ;;  %v465_v6 = vsel %vm401_vm2, %v1459_v4, 0.0 }
 0x2f7   :  { %466 = vadd.xlane.f32.xlu1 %v465_v6 }
 0x2f8   :  { %v1461_v7 = vpop.eup %1460 }
 0x2f9   :  { %v1463_v8 = vpop.eup %1462  ;;  %v468_v9 = vsel %vm401_vm2, %v1461_v7, 0.0 }
 0x2fa   :  { %469 = vadd.xlane.f32.xlu0 %v468_v9  ;;  %v471_v10 = vsel %vm401_vm2, %v1463_v8, 0.0  ;;  %v673_v9 = vld [vmem:[%s1883_s2 + $0x78] sm:$0xff] }
 0x2fb   :  { %472 = vadd.xlane.f32.xlu1 %v471_v10 }
 0x30c   :  { %1424 = vrot.lane.b32.xlu1 %v1423_v35, %s1523_s12 }
 0x310   :  { %1419 = vrot.lane.b32.xlu0 %v1423_v35, %s1522_s11  ;;  %1429 = vrot.lane.b32.xlu1 %v1423_v35, %s1521_s0 }
 0x37a   :  { %v455_v11 = vpop.xlane.xlu1 %454 }
 0x37b   :  { %1464 = vrcp.f32 %v455_v11  ;;  %v452_v12 = vpop.xlane.xlu0 %451 }
 0x37c   :  { %1466 = vrcp.f32 %v452_v12 }
 0x37f   :  { %v458_v15 = vpop.xlane.xlu0 %457 }
 0x380   :  { %1468 = vrcp.f32 %v458_v15  ;;  %v461_v17 = vpop.xlane.xlu1 %460 }
 0x381   :  { %1470 = vrcp.f32 %v461_v17 }
 0x383   :  { %v464_v19 = vpop.xlane.xlu0 %463 }
 0x384   :  { %1472 = vrcp.f32 %v464_v19  ;;  %v467_v20 = vpop.xlane.xlu1 %466 }
 0x385   :  { %v1465_v21 = vpop.eup %1464  ;;  %1474 = vrcp.f32 %v467_v20 }
 0x386   :  { %v1467_v22 = vpop.eup %1466  ;;  %v477_v23 = vmul.f32 %v1465_v21, %v1449_v57  ;;  %v1348_v57 = vpack.c.bf16 %v663_v56, %v662_v55  ;;  %v800_v55 = vld [vmem:[%s1883_s2 + $0x88] sm:$0xff]  ;;  %v801_v56 = vld [vmem:[%s1883_s2 + $0x90] sm:$0xff] }
 0x387   :  { %v470_v24 = vpop.xlane.xlu0 %469  ;;  %v475_v25 = vmul.f32 %v1467_v22, %v1451_v58  ;;  %v664_v58 = vld [vmem:[%s1883_s2 + $0x30] sm:$0xff] }
 0x388   :  { %491 = vst.msk [vmem:[%s1885_s4 + $0x8] sm:$0xff] %vm401_vm2, %v477_v23  ;;  %1476 = vrcp.f32 %v470_v24  ;;  %v473_v26 = vpop.xlane.xlu1 %472  ;;  %v1352_v60 = vpack.c.bf16 %v665_v59, %v664_v58  ;;  %v802_v58 = vld [vmem:[%s1883_s2 + $0x98] sm:$0xff] }
 0x389   :  { %1478 = vrcp.f32 %v473_v26  ;;  %490 = vst.msk [vmem:[%s1885_s4] sm:$0xff] %vm401_vm2, %v475_v25  ;;  %1207 = vmatprep.mubr.msk.f32.mxu1 %vm401_vm2, %v475_v25  ;;  %v1376_v59 = vpack.c.bf16 %v802_v58, %v801_v56 }
 0x38a   :  { %v1469_v27 = vpop.eup %1468 }
 0x38b   :  { %v1471_v28 = vpop.eup %1470  ;;  %v1420_v29 = vpop.permute.xlu0 %1419  ;;  %v479_v30 = vmul.f32 %v1469_v27, %v1453_v63  ;;  %v1356_v63 = vpack.c.bf16 %v667_v62, %v666_v61  ;;  %v888_v61 = vld [vmem:[%s1883_s2 + $0xa8] sm:$0xff] }
 0x38c   :  { %v1422_v31 = vunpack.i.h.bf16 %v1420_v29  ;;  %v1421_v32 = vunpack.i.l.bf16 %v1420_v29  ;;  %v1425_v33 = vpop.permute.xlu1 %1424  ;;  %v481_v34 = vmul.f32 %v1471_v28, %v1455_v0  ;;  %v668_v0 = vld [vmem:[%s1883_s2 + $0x50] sm:$0xff] }
 0x38d   :  { %v1427_v35 = vunpack.i.h.bf16 %v1425_v33  ;;  %v1426_v36 = vunpack.i.l.bf16 %v1425_v33  ;;  %492 = vst.msk [vmem:[%s1885_s4 + $0x10] sm:$0xff] %vm401_vm2, %v479_v30  ;;  %v1360_v2 = vpack.c.bf16 %v669_v1, %v668_v0 }
 0x38e   :  { %v1473_v37 = vpop.eup %1472  ;;  %v1328_v38 = vpack.c.bf16 %v1422_v31, %v1421_v32  ;;  %493 = vst.msk [vmem:[%s1885_s4 + $0x18] sm:$0xff] %vm401_vm2, %v481_v34 }
 0x38f   :  { %v1475_v39 = vpop.eup %1474  ;;  %v483_v40 = vmul.f32 %v1473_v37, %v1457_v3  ;;  %v1332_v41 = vpack.c.bf16 %v1427_v35, %v1426_v36  ;;  %v670_v3 = vld [vmem:[%s1883_s2 + $0x60] sm:$0xff] }
 0x390   :  { %v1430_v42 = vpop.permute.xlu1 %1429  ;;  %1329 = vmatprep.subr.bf16.mxu1 %v1328_v38  ;;  %v485_v43 = vmul.f32 %v1475_v39, %v1459_v4  ;;  %v671_v4 = vld [vmem:[%s1883_s2 + $0x68] sm:$0xff]  ;;  %v674_v39 = vld [vmem:[%s1882_s1 + $0x61] ss:$0 sm:$0xff] }
 0x391   :  { %v1432_v44 = vunpack.i.h.bf16 %v1430_v42  ;;  %v1431_v16 = vunpack.i.l.bf16 %v1430_v42  ;;  %1331 = vmatpush3.bf16.msra.mxu1 %v1328_v38  ;;  %494 = vst.msk [vmem:[%s1885_s4 + $0x20] sm:$0xff] %vm401_vm2, %v483_v40  ;;  %v1364_v5 = vpack.c.bf16 %v671_v4, %v670_v3 }
 0x392   :  { %v1477_v45 = vpop.eup %1476  ;;  %1333 = vmatprep.subr.bf16.mxu1 %v1332_v41  ;;  %495 = vst.msk [vmem:[%s1885_s4 + $0x28] sm:$0xff] %vm401_vm2, %v485_v43 }
 0x393   :  { %v1479_v46 = vpop.eup %1478  ;;  %v487_v18 = vmul.f32 %v1477_v45, %v1461_v7  ;;  %v1336_v47 = vpack.c.bf16 %v1432_v44, %v1431_v16 }
 0x394   :  { %v489_v48 = vmul.f32 %v1479_v46, %v1463_v8  ;;  %v672_v8 = vld [vmem:[%s1883_s2 + $0x70] sm:$0xff] }
 0x395   :  { %1335 = vmatpush3.bf16.msra.mxu1 %v1332_v41  ;;  %496 = vst.msk [vmem:[%s1885_s4 + $0x30] sm:$0xff] %vm401_vm2, %v487_v18  ;;  %v1368_v10 = vpack.c.bf16 %v673_v9, %v672_v8 }
 0x396   :  { %1337 = vmatprep.subr.bf16.mxu1 %v1336_v47  ;;  %497 = vst.msk [vmem:[%s1885_s4 + $0x38] sm:$0xff] %vm401_vm2, %v489_v48 }
 0x399   :  { %1339 = vmatpush3.bf16.msra.mxu1 %v1336_v47 }
 0x39a   :  { %1341 = vmatprep.subr.bf16.mxu1 %v1340_v52 }
 0x39c   :  { %1208 = vmatmul.mubr.msk.f32.vlgmr.msra.gmra.mrb[6].mxu1 %vm401_vm2, %v477_v23 }
 0x39d   :  { %1210 = vmatprep.mubr.msk.f32.mxu1 %vm401_vm2, %v479_v30  ;;  %1343 = vmatpush3.bf16.msra.mxu1 %v1340_v52 }
 0x39e   :  { %1345 = vmatprep.subr.bf16.mxu1 %v1344_v54 }
 0x3a0   :  { %1211 = vmatmul.mubr.msk.f32.gmra.mrb[8].mxu1 %vm401_vm2, %v481_v34 }
 0x3a1   :  { %1213 = vmatprep.mubr.msk.f32.mxu1 %vm401_vm2, %v483_v40  ;;  %1347 = vmatpush3.bf16.msra.mxu1 %v1344_v54 }
 0x3a2   :  { %1349 = vmatprep.subr.bf16.mxu1 %v1348_v57 }
 0x3a4   :  { %1214 = vmatmul.mubr.msk.f32.gmra.mrb[10].mxu1 %vm401_vm2, %v485_v43 }
 0x3a5   :  { %1216 = vmatprep.mubr.msk.f32.mxu1 %vm401_vm2, %v487_v18  ;;  %1351 = vmatpush3.bf16.msra.mxu1 %v1348_v57 }
 0x3a6   :  { %1353 = vmatprep.subr.bf16.mxu1 %v1352_v60 }
 0x3a8   :  { %1217 = vmatmul.mubr.msk.f32.gmra.mrb[12].mxu1 %vm401_vm2, %v489_v48 }
 0x3a9   :  { %1355 = vmatpush3.bf16.msra.mxu1 %v1352_v60  ;;  %v887_v60 = vld [vmem:[%s1883_s2 + $0xa0] sm:$0xff] }
 0x3aa   :  { %1357 = vmatprep.subr.bf16.mxu1 %v1356_v63  ;;  %v1380_v62 = vpack.c.bf16 %v888_v61, %v887_v60 }
 0x3ad   :  { %1359 = vmatpush3.bf16.msra.mxu1 %v1356_v63 }
 0x3ae   :  { %1361 = vmatprep.subr.bf16.mxu1 %v1360_v2 }
 0x3b1   :  { %1363 = vmatpush3.bf16.msra.mxu1 %v1360_v2 }
 0x3b2   :  { %1365 = vmatprep.subr.bf16.mxu1 %v1364_v5 }
 0x3b5   :  { %1367 = vmatpush3.bf16.msra.mxu1 %v1364_v5 }
 0x3b6   :  { %1369 = vmatprep.subr.bf16.mxu1 %v1368_v10 }
 0x3b9   :  { %1371 = vmatpush3.bf16.msra.mxu1 %v1368_v10 }
 0x46f   :  { %v1209_v6 = vpop.f32.mrb[6].mxu1 }
 0x470   :  { %v588_v7 = vpop.f32.mrb[7].mxu1 }
 0x473   :  { %v1212_v11 = vpop.f32.mrb[8].mxu1 }
 0x474   :  { %v598_v12 = vpop.f32.mrb[9].mxu1 }
 0x475   :  { %v1433_v15 = vpack.i.bf16 %v1212_v11, %v598_v12 }
 0x477   :  { %1434 = vrot.lane.b32.xlu0 %v1433_v15, %s1521_s0  ;;  %v1215_v17 = vpop.f32.mrb[10].mxu1 }
 0x478   :  { %v608_v19 = vpop.f32.mrb[11].mxu1 }
 0x479   :  { %v1438_v20 = vpack.i.bf16 %v1215_v17, %v608_v19 }
 0x47b   :  { %1439 = vrot.lane.b32.xlu1 %v1438_v20, %s1523_s12  ;;  %v1218_v21 = vpop.f32.mrb[12].mxu1  ;;  %v793_v20 = vld [vmem:[%s1882_s1 + $0x62] ss:$0 sm:$0xff] }
 0x47c   :  { %v618_v22 = vpop.f32.mrb[13].mxu1 }
 0x47d   :  { %v1443_v23 = vpack.i.bf16 %v1218_v21, %v618_v22 }
 0x47f   :  { %1444 = vrot.lane.b32.xlu0 %v1443_v23, %s1522_s11 }
 0x4e9   :  { %v1435_v24 = vpop.permute.xlu0 %1434 }
 0x4ea   :  { %v1437_v26 = vunpack.i.h.bf16 %v1435_v24  ;;  %v1436_v27 = vunpack.i.l.bf16 %v1435_v24 }
 0x4ec   :  { %v652_v31 = vsel %vm49_vm0, %v1209_v6, %v1437_v26  ;;  %v651_v34 = vsel %vm49_vm0, %v588_v7, %v1436_v27  ;;  %v889_v27 = vld [vmem:[%s1883_s2 + $0xb0] sm:$0xff] }
 0x4ed   :  { %v1440_v25 = vpop.permute.xlu1 %1439 }
 0x4ee   :  { %v1442_v28 = vunpack.i.h.bf16 %v1440_v25  ;;  %v1441_v29 = vunpack.i.l.bf16 %v1440_v25  ;;  %v796_v25 = vld [vmem:[%s1882_s1 + $0x63] ss:$0 sm:$0xff] }
 0x4f0   :  { %v654_v35 = vsel %vm401_vm2, %v652_v31, %v1442_v28  ;;  %v653_v36 = vsel %vm401_vm2, %v651_v34, %v1441_v29  ;;  %v890_v28 = vld [vmem:[%s1883_s2 + $0xb8] sm:$0xff] }
 0x4f1   :  { %v1445_v30 = vpop.permute.xlu0 %1444  ;;  %v1384_v31 = vpack.c.bf16 %v890_v28, %v889_v27 }
 0x4f2   :  { %v1447_v32 = vunpack.i.h.bf16 %v1445_v30  ;;  %v1446_v33 = vunpack.i.l.bf16 %v1445_v30 }
 0x4f4   :  { %v656_v37 = vsel %vm655_vm3, %v653_v36, %v1446_v33  ;;  %v657_v38 = vsel %vm655_vm3, %v654_v35, %v1447_v32  ;;  %v891_v32 = vld [vmem:[%s1883_s2 + $0xc0] sm:$0xff]  ;;  %v892_v33 = vld [vmem:[%s1883_s2 + $0xc8] sm:$0xff]  ;;  %v893_v35 = vld [vmem:[%s1883_s2 + $0xd0] sm:$0xff] }
 0x4f5   :  { %1251 = vmatprep.mubr.f32.mxu1 %v656_v37  ;;  %v1388_v34 = vpack.c.bf16 %v892_v33, %v891_v32  ;;  %v894_v36 = vld [vmem:[%s1883_s2 + $0xd8] sm:$0xff] }
 0x4f6   :  { %1252 = vmatmul.mubr.f32.vlgmr.msra.gmra.mrb[14].mxu1 %v657_v38  ;;  %v1392_v37 = vpack.c.bf16 %v894_v36, %v893_v35  ;;  %v803_v38 = vld [vmem:[%s1882_s1 + $0x64] ss:$0 sm:$0xff] }
 0x5c9   :  { %v1253_v40 = vpop.f32.mrb[14].mxu1 }
 0x5ca   :  { %v747_v41 = vadd.f32 %v1253_v40, %v674_v39  ;;  %v741_v42 = vpop.f32.mrb[15].mxu1 }
 0x5cb   :  { %v742_v43 = vadd.f32 %v741_v42, %v674_v39 }
 0x5cc   :  { %v751_v44 = vadd.f32 %v747_v41, %v1586_v14 }
 0x5cd   :  { %v750_v16 = vadd.f32 %v742_v43, %v1579_v13  ;;  %v799_v13 = vld [vmem:[%s1883_s2 + $0x80] sm:$0xff] }
 0x5ce   :  { %v755_v45 = vsel %vm49_vm0, %v751_v44, 0.0  ;;  %v1372_v57 = vpack.c.bf16 %v800_v55, %v799_v13 }
 0x5cf   :  { %756 = vadd.xlane.f32.xlu0 %v755_v45  ;;  %v752_v46 = vsel %vm49_vm0, %v750_v16, 0.0 }
 0x5d0   :  { %753 = vadd.xlane.f32.xlu1 %v752_v46  ;;  %1373 = vmatprep.subr.bf16.mxu0 %v1372_v57 }
 0x5d1   :  { %1375 = vmatpush3.bf16.msra.mxu0 %v1372_v57 }
 0x5d2   :  { %1377 = vmatprep.subr.bf16.mxu0 %v1376_v59 }
 0x5d5   :  { %1379 = vmatpush3.bf16.msra.mxu0 %v1376_v59 }
 0x5d6   :  { %1381 = vmatprep.subr.bf16.mxu0 %v1380_v62 }
 0x65c   :  { %v757_v18 = vpop.xlane.xlu0 %756 }
 0x65d   :  { %v760_v47 = vmul.f32 0.03125, %v757_v18  ;;  %v754_v48 = vpop.xlane.xlu1 %753 }
 0x65e   :  { %v759_v49 = vmul.f32 0.03125, %v754_v48 }
 0x65f   :  { %v762_v50 = vsub.f32 %v751_v44, %v760_v47 }
 0x660   :  { %v761_v51 = vsub.f32 %v750_v16, %v759_v49  ;;  %v895_v16 = vld [vmem:[%s1882_s1 + $0x65] ss:$0 sm:$0xff] }
 0x661   :  { %v764_v52 = vmul.f32 %v762_v50, %v762_v50 }
 0x662   :  { %v763_v53 = vmul.f32 %v761_v51, %v761_v51 }
 0x663   :  { %v768_v54 = vsel %vm49_vm0, %v764_v52, 0.0 }
 0x664   :  { %769 = vadd.xlane.f32.xlu1 %v768_v54  ;;  %v765_v14 = vsel %vm49_vm0, %v763_v53, 0.0 }
 0x665   :  { %766 = vadd.xlane.f32.xlu0 %v765_v14 }
 0x6f1   :  { %v770_v63 = vpop.xlane.xlu1 %769 }
 0x6f2   :  { %v772_v0 = vmul.f32 0.03125, %v770_v63  ;;  %v767_v1 = vpop.xlane.xlu0 %766 }
 0x6f3   :  { %v771_v2 = vmul.f32 0.03125, %v767_v1 }
 0x6f4   :  { %v774_v3 = vadd.f32 1e-09, %v772_v0 }
 0x6f5   :  { %v773_v4 = vadd.f32 1e-09, %v771_v2 }
 0x6f6   :  { %1480 = vrsqrt.f32 %v774_v3  ;;  %vm784_vm4 = vcmp.eq.f32.partialorder %v774_v3, inf  ;;  %v787_v8 = vand.u32 2147483648, %v774_v3  ;;  %vm786_vm5 = vcmp.eq.f32.partialorder %v774_v3, 0.0 }
 0x6f7   :  { %1482 = vrsqrt.f32 %v773_v4  ;;  %vm777_vm6 = vcmp.eq.f32.partialorder %v773_v4, inf  ;;  %v780_v11 = vand.u32 2147483648, %v773_v4  ;;  %vm779_vm7 = vcmp.eq.f32.partialorder %v773_v4, 0.0 }
 0x700   :  { %v1481_v5 = vpop.eup %1480 }
 0x701   :  { %v1483_v6 = vpop.eup %1482  ;;  %v783_v7 = vmul.f32 %v1481_v5, %v774_v3 }
 0x702   :  { %v776_v9 = vmul.f32 %v1483_v6, %v773_v4 }
 0x703   :  { %v785_v10 = vsel %vm784_vm4, %v774_v3, %v783_v7 }
 0x704   :  { %v788_v12 = vsel %vm786_vm5, %v787_v8, %v785_v10  ;;  %v778_v15 = vsel %vm777_vm6, %v773_v4, %v776_v9 }
 0x705   :  { %1484 = vrcp.f32 %v788_v12  ;;  %v781_v17 = vsel %vm779_vm7, %v780_v11, %v778_v15  ;;  %v1019_v15 = vld [vmem:[%s1882_s1 + $0x66] ss:$0 sm:$0xff] }
 0x706   :  { %1486 = vrcp.f32 %v781_v17 }
 0x70f   :  { %v1485_v19 = vpop.eup %1484 }
 0x710   :  { %v1487_v21 = vpop.eup %1486  ;;  %v792_v22 = vmul.f32 %v1485_v19, %v762_v50 }
 0x711   :  { %v790_v23 = vmul.f32 %v1487_v21, %v761_v51  ;;  %v1022_v21 = vld [vmem:[%s1882_s1 + $0x67] ss:$0 sm:$0xff] }
 0x712   :  { %v795_v24 = vmul.f32 %v793_v20, %v792_v22 }
 0x713   :  { %v794_v26 = vmul.f32 %v793_v20, %v790_v23 }
 0x714   :  { %v798_v30 = vadd.f32 %v796_v25, %v795_v24 }
 0x715   :  { %v797_v29 = vadd.f32 %v796_v25, %v794_v26 }
 0x717   :  { %1262 = vmatprep.mubr.msk.f32.mxu0 %vm49_vm0, %v797_v29 }
 0x718   :  { %1263 = vmatmul.mubr.msk.f32.vlgmr.msra.gmra.mrb[8].mxu0 %vm49_vm0, %v798_v30 }
 0x719   :  { %1383 = vmatpush3.bf16.msra.mxu0 %v1380_v62 }
 0x71a   :  { %1385 = vmatprep.subr.bf16.mxu0 %v1384_v31 }
 0x71d   :  { %1387 = vmatpush3.bf16.msra.mxu0 %v1384_v31 }
 0x71e   :  { %1389 = vmatprep.subr.bf16.mxu0 %v1388_v34 }
 0x721   :  { %1391 = vmatpush3.bf16.msra.mxu0 %v1388_v34 }
 0x722   :  { %1393 = vmatprep.subr.bf16.mxu0 %v1392_v37 }
 0x725   :  { %1395 = vmatpush3.bf16.msra.mxu0 %v1392_v37 }
 0x7eb   :  { %v1264_v39 = vpop.f32.mrb[8].mxu0 }
 0x7ec   :  { %v882_v40 = vadd.f32 %v1264_v39, %v803_v38  ;;  %v876_v41 = vpop.f32.mrb[9].mxu0 }
 0x7ed   :  { %v877_v42 = vadd.f32 %v876_v41, %v803_v38 }
 0x7ee   :  { %v886_v44 = vmax.f32 %v882_v40, 0.0 }
 0x7ef   :  { %v885_v43 = vmax.f32 %v877_v42, 0.0 }
 0x7f1   :  { %1281 = vmatprep.mubr.msk.f32.mxu0 %vm401_vm2, %v885_v43 }
 0x7f2   :  { %1282 = vmatmul.mubr.msk.f32.vlgmr.msra.gmra.mrb[10].mxu0 %vm401_vm2, %v886_v44 }
 0x8c5   :  { %v1283_v45 = vpop.f32.mrb[10].mxu0 }
 0x8c6   :  { %v974_v46 = vadd.f32 %v1283_v45, %v895_v16  ;;  %v968_v18 = vpop.f32.mrb[11].mxu0 }
 0x8c7   :  { %v969_v47 = vadd.f32 %v968_v18, %v895_v16 }
 0x8c8   :  { %v978_v48 = vadd.f32 %v974_v46, %v798_v30 }
 0x8c9   :  { %v977_v49 = vadd.f32 %v969_v47, %v797_v29 }
 0x8ca   :  { %v982_v50 = vsel %vm49_vm0, %v978_v48, 0.0 }
 0x8cb   :  { %983 = vadd.xlane.f32.xlu1 %v982_v50  ;;  %v979_v51 = vsel %vm49_vm0, %v977_v49, 0.0 }
 0x8cc   :  { %980 = vadd.xlane.f32.xlu0 %v979_v51 }
 0x958   :  { %v984_v52 = vpop.xlane.xlu1 %983 }
 0x959   :  { %v986_v53 = vmul.f32 0.03125, %v984_v52  ;;  %v981_v54 = vpop.xlane.xlu0 %980 }
 0x95a   :  { %v985_v14 = vmul.f32 0.03125, %v981_v54 }
 0x95b   :  { %v988_v13 = vsub.f32 %v978_v48, %v986_v53 }
 0x95c   :  { %v987_v55 = vsub.f32 %v977_v49, %v985_v14 }
 0x95d   :  { %v990_v56 = vmul.f32 %v988_v13, %v988_v13 }
 0x95e   :  { %v989_v57 = vmul.f32 %v987_v55, %v987_v55 }
 0x95f   :  { %v994_v58 = vsel %vm49_vm0, %v990_v56, 0.0 }
 0x960   :  { %995 = vadd.xlane.f32.xlu1 %v994_v58  ;;  %v991_v59 = vsel %vm49_vm0, %v989_v57, 0.0 }
 0x961   :  { %992 = vadd.xlane.f32.xlu0 %v991_v59 }
 0x9ed   :  { %v996_v60 = vpop.xlane.xlu1 %995 }
 0x9ee   :  { %v998_v61 = vmul.f32 0.03125, %v996_v60  ;;  %v993_v62 = vpop.xlane.xlu0 %992 }
 0x9ef   :  { %v997_v63 = vmul.f32 0.03125, %v993_v62 }
 0x9f0   :  { %v1000_v0 = vadd.f32 1e-09, %v998_v61 }
 0x9f1   :  { %v999_v1 = vadd.f32 1e-09, %v997_v63 }
 0x9f2   :  { %1488 = vrsqrt.f32 %v1000_v0  ;;  %vm1010_vm8 = vcmp.eq.f32.partialorder %v1000_v0, inf  ;;  %v1013_v5 = vand.u32 2147483648, %v1000_v0  ;;  %vm1012_vm9 = vcmp.eq.f32.partialorder %v1000_v0, 0.0 }
 0x9f3   :  { %1490 = vrsqrt.f32 %v999_v1  ;;  %vm1003_vm10 = vcmp.eq.f32.partialorder %v999_v1, inf  ;;  %v1006_v8 = vand.u32 2147483648, %v999_v1  ;;  %vm1005_vm11 = vcmp.eq.f32.partialorder %v999_v1, 0.0 }
 0x9fc   :  { %v1489_v2 = vpop.eup %1488 }
 0x9fd   :  { %v1491_v3 = vpop.eup %1490  ;;  %v1009_v4 = vmul.f32 %v1489_v2, %v1000_v0 }
 0x9fe   :  { %v1002_v6 = vmul.f32 %v1491_v3, %v999_v1 }
 0x9ff   :  { %v1011_v7 = vsel %vm1010_vm8, %v1000_v0, %v1009_v4 }
 0xa00   :  { %v1014_v9 = vsel %vm1012_vm9, %v1013_v5, %v1011_v7  ;;  %v1004_v10 = vsel %vm1003_vm10, %v999_v1, %v1002_v6 }
 0xa01   :  { %1492 = vrcp.f32 %v1014_v9  ;;  %v1007_v11 = vsel %vm1005_vm11, %v1006_v8, %v1004_v10 }
 0xa02   :  { %1494 = vrcp.f32 %v1007_v11 }
 0xa0b   :  { %v1493_v12 = vpop.eup %1492 }
 0xa0c   :  { %v1495_v17 = vpop.eup %1494  ;;  %v1018_v19 = vmul.f32 %v1493_v12, %v988_v13 }
 0xa0d   :  { %v1016_v20 = vmul.f32 %v1495_v17, %v987_v55 }
 0xa0e   :  { %v1021_v22 = vmul.f32 %v1019_v15, %v1018_v19 }
 0xa0f   :  { %v1020_v23 = vmul.f32 %v1019_v15, %v1016_v20 }
 0xa10   :  { %v1024_v24 = vadd.f32 %v1022_v21, %v1021_v22 }
 0xa11   :  { %v1023_v25 = vadd.f32 %v1022_v21, %v1020_v23 }
 0xa12   :  { %1026 = vst.msk [vmem:[#allocation2 + $0x8] sm:$0xff] %vm49_vm0, %v1024_v24 }
 0xa13   :  { %1025 = vst.msk [vmem:[#allocation2] sm:$0xff] %vm49_vm0, %v1023_v25 }
 0xa14   :  { %1507 = shalt.err (!%p1504_p4)
}
 0xa15   :  { %s1508_s21 = scalar_lea.hbm %s1884_s3, 256 }
 0xa16   :  { %p1509_p5 = scmp.ne.s32.totalorder %s1884_s3, %s1508_s21  ;;  %p1512_p6 = scmp.lt.u32.totalorder %s1508_s21, %s1884_s3 }
 0xa18   :  { %p1514_p7 = pnand %p1512_p6, %p1509_p5 }
 0xa1a   :  { %1517 = shalt.err (!%p1514_p7)
}
 0xa1b   :  { %s1525_s26 = smov 128   ;;  %s1526_s27 = smov 8  }
 0xa1c   :  { %1038 = dma.vmem_to_hbm [thread:$0]  %s1033_s18, 256, %s1884_s3, [#allocation3], %s1525_s26, %s1525_s26, %s1526_s27  }
 0xa1d   :  { %1518 = dma.done.wait [#allocation3], 256  }
 0xa1e   :  { %1519 = vsyncadd [#allocation3], 4294967040 }
 0xa1f   :  { %1046 = vsyncpa [#allocation3], 1 }

</bundles_post_ra>
